<compile_context>
chip_gen: v7x
topology: tpu7x:2x2x1
jax: 0.10.0
libtpu: 0.0.40
codegen_flags: <defaults>
</compile_context>

<pallas_src>
import functools

import jax
import jax.numpy as jnp
from jax import lax
from jax.experimental import pallas as pl
from jax.experimental.pallas import tpu as pltpu


def _vmem_limit_bytes():
    """Per-generation VMEM limit: ~75% of physical, capped; safe fallback."""
    try:
        cap = pltpu.get_tpu_info().vmem_capacity_bytes
        return int(min(int(cap * 0.75), 100 << 20))
    except Exception:
        return 48 << 20  # safe on v5e/v6e (128 MiB) and v7x (64 MiB)


def _fit_tile(n, want, align):
    """Largest tile <= want that divides n and is a multiple of `align`
    (or the full extent n)."""
    if want >= n or n <= align:
        return n
    t = (min(want, n) // align) * align
    while t > 0 and n % t:
        t -= align
    return t if t > 0 else n


# ---------------------------------------------------------------------------
# Kernel A: GroupNorm-1 apply (precomputed scale/shift) + fused QKV projection
#   reads  x      as (1, C, tn)  blocks of the natural (B, C, N) layout
#   writes qkv    as (1, 3, tn, C) blocks of a single fused (B, 3, N, C) bf16
# ---------------------------------------------------------------------------
def qkv_kernel(x_ref, scale_ref, shift_ref, wqkv_ref, bqkv_ref, qkv_ref, *, c):
    x_cn = x_ref[0]                                    # (C, TN) f32
    h_cn = x_cn * scale_ref[0] + shift_ref[0]          # GN1 as per-channel FMA
    h_nc = jnp.transpose(h_cn).astype(jnp.bfloat16)    # (TN, C) — XLU is idle here
    qkv = jnp.dot(h_nc, wqkv_ref[...],
                  preferred_element_type=jnp.float32) + bqkv_ref[...]   # (TN, 3C)
    # Column slices are tile-aligned whenever C % 128 == 0 (production case).
    qkv_ref[0, 0] = qkv[:, :c].astype(jnp.bfloat16)          # q (scale pre-folded)
    qkv_ref[0, 1] = qkv[:, c:2 * c].astype(jnp.bfloat16)     # k
    qkv_ref[0, 2] = qkv[:, 2 * c:].astype(jnp.bfloat16)      # v


# ---------------------------------------------------------------------------
# Kernel B: flash attention (online softmax) + proj_out + residual add
#           + GN2 partial statistics (sum, sumsq per channel)
# ---------------------------------------------------------------------------
def attn_kernel(q_ref, k_ref, v_ref, xres_ref, wp_ref, bp_ref,
                a_ref, stats_ref, m_sc, l_sc, acc_sc):
    ki = pl.program_id(2)

    @pl.when(ki == 0)
    def _():
        m_sc[...] = jnp.full_like(m_sc[...], -jnp.inf)
        l_sc[...] = jnp.zeros_like(l_sc[...])
        acc_sc[...] = jnp.zeros_like(acc_sc[...])

    q = q_ref[0, 0]                                    # (TQ, C) bf16, C^-0.5 folded in
    k = k_ref[0, 0]                                    # (TK, C) bf16
    # s[i, j] = <q_i, k_j>; contract on axis 1 of both operands (no .T)
    s = lax.dot_general(q, k, (((1,), (1,)), ((), ())),
                        preferred_element_type=jnp.float32)             # (TQ, TK)

    m_prev = m_sc[...]                                 # (TQ, 1) f32
    m_new = jnp.maximum(m_prev, jnp.max(s, axis=-1, keepdims=True))
    alpha = jnp.exp(m_prev - m_new)
    p = jnp.exp(s - m_new)                             # unnormalized probs, f32

    l_sc[...] = alpha * l_sc[...] + jnp.sum(p, axis=-1, keepdims=True)
    acc_sc[...] = alpha * acc_sc[...] + jnp.dot(
        p.astype(jnp.bfloat16), v_ref[0, 0], preferred_element_type=jnp.float32)
    m_sc[...] = m_new

    @pl.when(ki == pl.num_programs(2) - 1)
    def _():
        out = acc_sc[...] * pl.reciprocal(l_sc[...], approx=True)        # (TQ, C)
        proj = jnp.dot(out.astype(jnp.bfloat16), wp_ref[...],
                       preferred_element_type=jnp.float32) + bp_ref[...]  # (TQ, C)
        a_cn = jnp.transpose(proj) + xres_ref[0]       # residual, (C, TQ) f32
        a_ref[0] = a_cn.astype(jnp.bfloat16)
        # GN2 partial statistics (f32, from the un-rounded tile)
        s1 = jnp.sum(a_cn, axis=1, keepdims=True)              # (C, 1)
        s2 = jnp.sum(a_cn * a_cn, axis=1, keepdims=True)       # (C, 1)
        stats_ref[0, 0] = jnp.concatenate([s1, s2], axis=1)    # (C, 2)


# ---------------------------------------------------------------------------
# Kernel C: GroupNorm-2 apply (precomputed scale/shift) + Swish, (B, C, N) layout
# ---------------------------------------------------------------------------
def gn_swish_kernel(a_ref, scale_ref, shift_ref, o_ref):
    y = a_ref[0].astype(jnp.float32) * scale_ref[0] + shift_ref[0]   # (C, TN)
    o_ref[0] = y * jax.nn.sigmoid(y)


# ---------------------------------------------------------------------------
# XLA helpers (tiny, scalar-ish work)
# ---------------------------------------------------------------------------
def _gn1_scale_shift(x_bcn, gamma, beta, groups, eps):
    """Two-pass GN stats on the input (natural (B, C, N) layout)."""
    B, C, N = x_bcn.shape
    gs = C // groups
    xg = x_bcn.reshape(B, groups, gs, N)
    mean = jnp.mean(xg, axis=(2, 3), keepdims=True)                   # (B,G,1,1)
    var = jnp.mean(jnp.square(xg - mean), axis=(2, 3), keepdims=True)
    inv = lax.rsqrt(var + eps)
    mean_c = jnp.broadcast_to(mean, (B, groups, gs, 1)).reshape(B, C, 1)
    inv_c = jnp.broadcast_to(inv, (B, groups, gs, 1)).reshape(B, C, 1)
    scale = inv_c * gamma.reshape(1, C, 1)
    shift = beta.reshape(1, C, 1) - mean_c * scale
    return scale, shift                                               # (B, C, 1) f32


def _gn2_from_stats(stats, gamma, beta, n_total, groups, eps):
    """Finalize GN2 scale/shift from kernel-B partial (sum, sumsq) stats."""
    B, _, C, _ = stats.shape
    gs = C // groups
    tot = jnp.sum(stats, axis=1)                                      # (B, C, 2)
    g = tot.reshape(B, groups, gs, 2).sum(axis=2)                     # (B, G, 2)
    cnt = float(n_total * gs)
    mean_g = g[..., 0] / cnt
    var_g = jnp.maximum(g[..., 1] / cnt - mean_g * mean_g, 0.0)
    inv_g = lax.rsqrt(var_g + eps)
    mean_c = jnp.repeat(mean_g, gs, axis=1)                           # (B, C)
    inv_c = jnp.repeat(inv_g, gs, axis=1)
    scale = inv_c * gamma.reshape(1, C)
    shift = beta.reshape(1, C) - mean_c * scale
    return scale[..., None], shift[..., None]                         # (B, C, 1) f32


# ---------------------------------------------------------------------------
# Wrapper
# ---------------------------------------------------------------------------
def nonlocal_block(x_ncdhw, params, *, groups=32, eps=1e-5,
                   tq=1024, tk=512, tn=1024):
    """x_ncdhw: (B, C, D, H, W) float32 (PyTorch NCDHW layout)."""
    B, C, D, H, W = x_ncdhw.shape
    N = D * H * W
    assert C % groups == 0

    # (B, C, D, H, W) -> (B, C, N) is a free, contiguous reshape (no transpose).
    x_bcn = x_ncdhw.reshape(B, C, N)

    # Tiles: tq/tn appear as lane dims -> multiple of 128 (or full N);
    # tk only as second-minor -> multiple of 8 (or full N).
    tq = _fit_tile(N, tq, 128)
    tk = _fit_tile(N, tk, 8)
    tn = _fit_tile(N, tn, 128)
    # Keep >= 2 parallel grid points so both TCs get work on v7x.
    while (B * (N // tq) < 2 and tq > 128
           and N % (tq // 2) == 0 and (tq // 2) % 128 == 0):
        tq //= 2

    vmem_limit = _vmem_limit_bytes()

    # GN1 global stats (cheap XLA reduction on the natural layout).
    scale1, shift1 = _gn1_scale_shift(x_bcn, params["g1"], params["b1"], groups, eps)

    # Fused QKV weights; the C^-0.5 attention scale is folded into Wq / bq.
    csc = float(C) ** (-0.5)
    wqkv = jnp.concatenate([params["wq"] * csc, params["wk"], params["wv"]],
                           axis=1).astype(jnp.bfloat16)               # (C, 3C)
    bqkv = jnp.concatenate([params["bq"] * csc, params["bk"], params["bv"]],
                           axis=1).astype(jnp.float32)                # (1, 3C)
    wp = params["wp"].astype(jnp.bfloat16)                            # (C, C)
    bp = params["bp"].astype(jnp.float32)                             # (1, C)

    # ---- Kernel A: GN1 + fused QKV -> single (B, 3, N, C) bf16 tensor -------
    qkv = pl.pallas_call(
        functools.partial(qkv_kernel, c=C),
        out_shape=jax.ShapeDtypeStruct((B, 3, N, C), jnp.bfloat16),
        grid_spec=pltpu.PrefetchScalarGridSpec(
            num_scalar_prefetch=0,
            grid=(B, N // tn),
            in_specs=[
                pl.BlockSpec((1, C, tn), lambda b, i: (b, 0, i)),     # x (B,C,N)
                pl.BlockSpec((1, C, 1), lambda b, i: (b, 0, 0)),      # gn1 scale
                pl.BlockSpec((1, C, 1), lambda b, i: (b, 0, 0)),      # gn1 shift
                pl.BlockSpec((C, 3 * C), lambda b, i: (0, 0)),        # Wqkv
                pl.BlockSpec((1, 3 * C), lambda b, i: (0, 0)),        # bqkv
            ],
            out_specs=pl.BlockSpec((1, 3, tn, C), lambda b, i: (b, 0, i, 0)),
        ),
        compiler_params=pltpu.CompilerParams(
            dimension_semantics=("parallel", "parallel"),
            vmem_limit_bytes=vmem_limit),
    )(x_bcn, scale1, shift1, wqkv, bqkv)

    # ---- Kernel B: flash attention + proj_out + residual + GN2 partials -----
    nq = N // tq
    a, stats = pl.pallas_call(
        attn_kernel,
        out_shape=(jax.ShapeDtypeStruct((B, C, N), jnp.bfloat16),
                   jax.ShapeDtypeStruct((B, nq, C, 2), jnp.float32)),
        grid_spec=pltpu.PrefetchScalarGridSpec(
            num_scalar_prefetch=0,
            grid=(B, nq, N // tk),
            in_specs=[
                pl.BlockSpec((1, 1, tq, C), lambda b, qi, ki: (b, 0, qi, 0)),  # q
                pl.BlockSpec((1, 1, tk, C), lambda b, qi, ki: (b, 1, ki, 0)),  # k
                pl.BlockSpec((1, 1, tk, C), lambda b, qi, ki: (b, 2, ki, 0)),  # v
                pl.BlockSpec((1, C, tq), lambda b, qi, ki: (b, 0, qi)),        # x residual
                pl.BlockSpec((C, C), lambda b, qi, ki: (0, 0)),                # Wproj
                pl.BlockSpec((1, C), lambda b, qi, ki: (0, 0)),                # bproj
            ],
            out_specs=(pl.BlockSpec((1, C, tq), lambda b, qi, ki: (b, 0, qi)),
                       pl.BlockSpec((1, 1, C, 2), lambda b, qi, ki: (b, qi, 0, 0))),
            scratch_shapes=[
                pltpu.VMEM((tq, 1), jnp.float32),   # m
                pltpu.VMEM((tq, 1), jnp.float32),   # l
                pltpu.VMEM((tq, C), jnp.float32),   # acc
            ],
        ),
        compiler_params=pltpu.CompilerParams(
            dimension_semantics=("parallel", "parallel", "arbitrary"),
            vmem_limit_bytes=vmem_limit),
    )(qkv, qkv, qkv, x_bcn, wp, bp)

    # GN2 scale/shift from the tiny per-tile partial statistics (no extra pass
    # over the full (B, N, C) intermediate).
    scale2, shift2 = _gn2_from_stats(stats, params["g2"], params["b2"], N, groups, eps)

    # ---- Kernel C: GN2 apply + Swish, emits (B, C, N) directly --------------
    y = pl.pallas_call(
        gn_swish_kernel,
        out_shape=jax.ShapeDtypeStruct((B, C, N), jnp.float32),
        grid_spec=pltpu.PrefetchScalarGridSpec(
            num_scalar_prefetch=0,
            grid=(B, N // tn),
            in_specs=[
                pl.BlockSpec((1, C, tn), lambda b, i: (b, 0, i)),     # A (bf16)
                pl.BlockSpec((1, C, 1), lambda b, i: (b, 0, 0)),      # gn2 scale
                pl.BlockSpec((1, C, 1), lambda b, i: (b, 0, 0)),      # gn2 shift
            ],
            out_specs=pl.BlockSpec((1, C, tn), lambda b, i: (b, 0, i)),
        ),
        compiler_params=pltpu.CompilerParams(
            dimension_semantics=("parallel", "parallel"),
            vmem_limit_bytes=vmem_limit),
    )(a, scale2, shift2)

    # (B, C, N) -> (B, C, D, H, W) is a free reshape.
    return y.reshape(B, C, D, H, W)


# ---------------------------------------------------------------------------
# Pure-JAX reference mirroring the PyTorch forward (f32 throughout)
# ---------------------------------------------------------------------------
def nonlocal_block_ref(x_ncdhw, params, *, groups=32, eps=1e-5):
    B, C, D, H, W = x_ncdhw.shape
    N = D * H * W
    gs = C // groups

    def gn(x, gamma, beta):
        xg = x.reshape(B, groups, gs, N)
        mean = xg.mean(axis=(2, 3), keepdims=True)
        var = ((xg - mean) ** 2).mean(axis=(2, 3), keepdims=True)
        xn = (xg - mean) / jnp.sqrt(var + eps)
        xn = xn.reshape(B, C, N)
        return xn * gamma.reshape(1, C, 1) + beta.reshape(1, C, 1)

    x = x_ncdhw.reshape(B, C, N)
    h_ = gn(x, params["g1"][0], params["b1"][0])
    lin = lambda h, w, bias: jnp.einsum("io,bin->bon", w, h) + bias[0][None, :, None]
    q = lin(h_, params["wq"], params["bq"])
    k = lin(h_, params["wk"], params["bk"])
    v = lin(h_, params["wv"], params["bv"])
    attn = jnp.einsum("bcn,bcm->bnm", q, k) * (float(C) ** (-0.5))
    attn = jax.nn.softmax(attn, axis=2)
    a = jnp.einsum("bcm,bnm->bcn", v, attn)
    a = lin(a, params["wp"], params["bp"]) + x
    y = gn(a, params["g2"][0], params["b2"][0])
    y = y * jax.nn.sigmoid(y)
    return y.reshape(B, C, D, H, W)


def make_params(key, C):
    """Deterministic synthetic parameters (conv weights stored as (Cin, Cout))."""
    ks = jax.random.split(key, 8)
    scale = 0.1
    return {
        "g1": jnp.ones((1, C), jnp.float32),
        "b1": jnp.zeros((1, C), jnp.float32),
        "wq": scale * jax.random.normal(ks[0], (C, C), jnp.float32),
        "bq": scale * jax.random.normal(ks[1], (1, C), jnp.float32),
        "wk": scale * jax.random.normal(ks[2], (C, C), jnp.float32),
        "bk": scale * jax.random.normal(ks[3], (1, C), jnp.float32),
        "wv": scale * jax.random.normal(ks[4], (C, C), jnp.float32),
        "bv": scale * jax.random.normal(ks[5], (1, C), jnp.float32),
        "wp": scale * jax.random.normal(ks[6], (C, C), jnp.float32),
        "bp": scale * jax.random.normal(ks[7], (1, C), jnp.float32),
        "g2": jnp.ones((1, C), jnp.float32),
        "b2": jnp.zeros((1, C), jnp.float32),
    }


if __name__ == "__main__":
    key = jax.random.PRNGKey(0)
    kx, kp = jax.random.split(key)

    # channels must be divisible by 32 (GroupNorm num_groups=32)
    B, C, D, H, W = 2, 32, 4, 4, 4
    x = jax.random.normal(kx, (B, C, D, H, W), jnp.float32)
    params = make_params(kp, C)

    out = jax.block_until_ready(nonlocal_block(x, params))
    ref = nonlocal_block_ref(x, params)

    assert out.shape == (B, C, D, H, W)
    max_err = float(jnp.max(jnp.abs(out - ref)))
    # bf16 MXU operands / bf16 `a` intermediate with f32 accumulation
    # -> relaxed tolerance vs the f32 reference
    assert jnp.allclose(out, ref, rtol=2e-2, atol=2e-2), max_err

    print("KERNEL_OK")
</pallas_src>

<mosaic_0001>
module attributes {stable_mosaic.version = 11 : i64} {
  func.func @qkv_kernel(%arg0: i32, %arg1: i32, %arg2: memref<1x32x64xf32, #tpu.memory_space<vmem>>, %arg3: memref<1x32x1xf32, #tpu.memory_space<vmem>>, %arg4: memref<1x32x1xf32, #tpu.memory_space<vmem>>, %arg5: memref<32x96xbf16, #tpu.memory_space<vmem>>, %arg6: memref<1x96xf32, #tpu.memory_space<vmem>>, %arg7: memref<1x3x64x32xbf16, #tpu.memory_space<vmem>>) attributes {dimension_semantics = [#tpu.dimension_semantics<parallel>, #tpu.dimension_semantics<parallel>], iteration_bounds = array<i64: 2, 1>, scalar_prefetch = 0 : i64, scratch_operands = 0 : i64, tpu.core_type = #tpu.core_type<tc>, window_params = [{transform_indices = @transform_0, window_bounds = array<i64: 1, 32, 64>}, {transform_indices = @transform_1, window_bounds = array<i64: 1, 32, 1>}, {transform_indices = @transform_2, window_bounds = array<i64: 1, 32, 1>}, {pipeline_mode = #tpu.pipeline_mode<synchronous>, transform_indices = @transform_3, window_bounds = array<i64: 32, 96>}, {pipeline_mode = #tpu.pipeline_mode<synchronous>, transform_indices = @transform_4, window_bounds = array<i64: 1, 96>}, {transform_indices = @transform_5, window_bounds = array<i64: 1, 3, 64, 32>}]} {
    %c0 = arith.constant 0 : index
    %c0_0 = arith.constant 0 : index
    %c0_1 = arith.constant 0 : index
    %0 = vector.load %arg2[%c0, %c0_0, %c0_1] : memref<1x32x64xf32, #tpu.memory_space<vmem>>, vector<1x32x64xf32>
    %1 = vector.shape_cast %0 : vector<1x32x64xf32> to vector<32x64xf32>
    %c0_2 = arith.constant 0 : index
    %c0_3 = arith.constant 0 : index
    %c0_4 = arith.constant 0 : index
    %2 = vector.load %arg3[%c0_2, %c0_3, %c0_4] : memref<1x32x1xf32, #tpu.memory_space<vmem>>, vector<1x32x1xf32>
    %3 = vector.shape_cast %2 : vector<1x32x1xf32> to vector<32x1xf32>
    %4 = vector.broadcast %3 : vector<32x1xf32> to vector<32x64xf32>
    %5 = arith.mulf %1, %4 : vector<32x64xf32>
    %c0_5 = arith.constant 0 : index
    %c0_6 = arith.constant 0 : index
    %c0_7 = arith.constant 0 : index
    %6 = vector.load %arg4[%c0_5, %c0_6, %c0_7] : memref<1x32x1xf32, #tpu.memory_space<vmem>>, vector<1x32x1xf32>
    %7 = vector.shape_cast %6 : vector<1x32x1xf32> to vector<32x1xf32>
    %8 = vector.broadcast %7 : vector<32x1xf32> to vector<32x64xf32>
    %9 = arith.addf %5, %8 : vector<32x64xf32>
    %10 = tpu.transpose %9, [1, 0] : vector<32x64xf32> -> vector<64x32xf32>
    %11 = arith.truncf %10 : vector<64x32xf32> to vector<64x32xbf16>
    %c0_8 = arith.constant 0 : index
    %c0_9 = arith.constant 0 : index
    %12 = vector.load %arg5[%c0_8, %c0_9] : memref<32x96xbf16, #tpu.memory_space<vmem>>, vector<32x96xbf16>
    %cst = arith.constant dense<0.000000e+00> : vector<64x96xf32>
    %13 = tpu.matmul %11, %12, %cst {dimension_numbers = #tpu.dot_dimension_numbers<[1], [0], [0], [1], [0, 0, 1, 1], [], []>} : vector<64x32xbf16>, vector<32x96xbf16>, vector<64x96xf32> -> vector<64x96xf32>
    %c0_10 = arith.constant 0 : index
    %c0_11 = arith.constant 0 : index
    %14 = vector.load %arg6[%c0_10, %c0_11] : memref<1x96xf32, #tpu.memory_space<vmem>>, vector<1x96xf32>
    %15 = vector.broadcast %14 : vector<1x96xf32> to vector<64x96xf32>
    %16 = arith.addf %13, %15 : vector<64x96xf32>
    %17 = vector.extract_strided_slice %16 {offsets = [0, 0], sizes = [64, 32], strides = [1, 1]} : vector<64x96xf32> to vector<64x32xf32>
    %18 = arith.truncf %17 : vector<64x32xf32> to vector<64x32xbf16>
    %c0_12 = arith.constant 0 : index
    %c0_13 = arith.constant 0 : index
    %c0_14 = arith.constant 0 : index
    %c0_15 = arith.constant 0 : index
    %19 = vector.load %arg7[%c0_12, %c0_13, %c0_14, %c0_15] : memref<1x3x64x32xbf16, #tpu.memory_space<vmem>>, vector<1x1x64x32xbf16>
    %20 = vector.shape_cast %19 : vector<1x1x64x32xbf16> to vector<64x32xbf16>
    %21 = vector.shape_cast %18 : vector<64x32xbf16> to vector<1x1x64x32xbf16>
    tpu.vector_store %arg7[%c0_12, %c0_13, %c0_14, %c0_15], %21 {strides = array<i32>} : memref<1x3x64x32xbf16, #tpu.memory_space<vmem>>, vector<1x1x64x32xbf16>,
    %22 = vector.extract_strided_slice %16 {offsets = [0, 32], sizes = [64, 32], strides = [1, 1]} : vector<64x96xf32> to vector<64x32xf32>
    %23 = arith.truncf %22 : vector<64x32xf32> to vector<64x32xbf16>
    %c0_16 = arith.constant 0 : index
    %c1 = arith.constant 1 : index
    %c0_17 = arith.constant 0 : index
    %c0_18 = arith.constant 0 : index
    %24 = vector.load %arg7[%c0_16, %c1, %c0_17, %c0_18] : memref<1x3x64x32xbf16, #tpu.memory_space<vmem>>, vector<1x1x64x32xbf16>
    %25 = vector.shape_cast %24 : vector<1x1x64x32xbf16> to vector<64x32xbf16>
    %26 = vector.shape_cast %23 : vector<64x32xbf16> to vector<1x1x64x32xbf16>
    tpu.vector_store %arg7[%c0_16, %c1, %c0_17, %c0_18], %26 {strides = array<i32>} : memref<1x3x64x32xbf16, #tpu.memory_space<vmem>>, vector<1x1x64x32xbf16>,
    %27 = vector.extract_strided_slice %16 {offsets = [0, 64], sizes = [64, 32], strides = [1, 1]} : vector<64x96xf32> to vector<64x32xf32>
    %28 = arith.truncf %27 : vector<64x32xf32> to vector<64x32xbf16>
    %c0_19 = arith.constant 0 : index
    %c2 = arith.constant 2 : index
    %c0_20 = arith.constant 0 : index
    %c0_21 = arith.constant 0 : index
    %29 = vector.load %arg7[%c0_19, %c2, %c0_20, %c0_21] : memref<1x3x64x32xbf16, #tpu.memory_space<vmem>>, vector<1x1x64x32xbf16>
    %30 = vector.shape_cast %29 : vector<1x1x64x32xbf16> to vector<64x32xbf16>
    %31 = vector.shape_cast %28 : vector<64x32xbf16> to vector<1x1x64x32xbf16>
    tpu.vector_store %arg7[%c0_19, %c2, %c0_20, %c0_21], %31 {strides = array<i32>} : memref<1x3x64x32xbf16, #tpu.memory_space<vmem>>, vector<1x1x64x32xbf16>,
    return
  }
  func.func @transform_0(%arg0: i32, %arg1: i32) -> (i32, i32, i32) {
    %c0_i32 = arith.constant 0 : i32
    %c0_i32_0 = arith.constant 0 : i32
    return %arg0, %c0_i32, %arg1 : i32, i32, i32
  }
  func.func @transform_1(%arg0: i32, %arg1: i32) -> (i32, i32, i32) {
    %c0_i32 = arith.constant 0 : i32
    %c0_i32_0 = arith.constant 0 : i32
    %c0_i32_1 = arith.constant 0 : i32
    return %arg0, %c0_i32, %c0_i32_0 : i32, i32, i32
  }
  func.func @transform_2(%arg0: i32, %arg1: i32) -> (i32, i32, i32) {
    %c0_i32 = arith.constant 0 : i32
    %c0_i32_0 = arith.constant 0 : i32
    %c0_i32_1 = arith.constant 0 : i32
    return %arg0, %c0_i32, %c0_i32_0 : i32, i32, i32
  }
  func.func @transform_3(%arg0: i32, %arg1: i32) -> (i32, i32) {
    %c0_i32 = arith.constant 0 : i32
    %c0_i32_0 = arith.constant 0 : i32
    %c0_i32_1 = arith.constant 0 : i32
    return %c0_i32, %c0_i32_0 : i32, i32
  }
  func.func @transform_4(%arg0: i32, %arg1: i32) -> (i32, i32) {
    %c0_i32 = arith.constant 0 : i32
    %c0_i32_0 = arith.constant 0 : i32
    %c0_i32_1 = arith.constant 0 : i32
    return %c0_i32, %c0_i32_0 : i32, i32
  }
  func.func @transform_5(%arg0: i32, %arg1: i32) -> (i32, i32, i32, i32) {
    %c0_i32 = arith.constant 0 : i32
    %c0_i32_0 = arith.constant 0 : i32
    %c0_i32_1 = arith.constant 0 : i32
    return %arg0, %c0_i32, %arg1, %c0_i32_0 : i32, i32, i32, i32
  }
}

</mosaic_0001>

<bundles_post_ra>
// kernel: tpu_custom_call.1
= control target key start
LH: loop header
LB: loop body
LE: loop exit
PB: predicated region body
PF: predicated region fallthrough
CT: control target
= control target key end

     0   :  { %s883_s18 = smov 0   ;;  %s885_s19 = smov 0   ;;  %s1001_s0 = inlined_call_operand.vmem [shape: f32[2,32,64], index: 0, kind: input, shape index: {}]   ;;  %s1002_s1 = inlined_call_operand.vmem [shape: f32[2,32,1], index: 1, kind: input, shape index: {}]   ;;  %s1003_s2 = inlined_call_operand.vmem [shape: f32[2,32,1], index: 2, kind: input, shape index: {}]   ;;  %s1004_s3 = inlined_call_operand.vmem [shape: bf16[32,96], index: 3, kind: input, shape index: {}]   ;;  %s1005_s4 = inlined_call_operand.vmem [shape: f32[1,96], index: 4, kind: input, shape index: {}]   ;;  %s1006_s5 = inlined_call_operand.vmem [shape: bf16[2,3,64,32], index: 5, kind: output, shape index: {}]  }
   0x1   :  { %s887_s20 = smov 0  }
   0x2 LB: > { %s27_s21 = sadd.s32 1, %s844_s19  ;;  %p719_p0 = scmp.ge.s32.totalorder %s848_s20, 1  ;;  %s848_s20 = sphi %s887_s20, %s15_s20   ;;  %s844_s19 = sphi %s885_s19, %s1008_s19   ;;  %s840_s18 = sphi %s883_s18, %s1007_s18  }
   0x3   : > { %p29_p1 = scmp.ge.s32.totalorder %s27_s21, 2  ;;  %p226_p2 = scmp.lt.s32.totalorder %s848_s20, 3 }
   0x5   : > { %s1010_s21 = smov (%p29_p1, %s27_s21), 0  ;;  %p227_p3 = pnand %p719_p0, %p226_p2 }
   0x6   : > { %p271_p4 = scmp.lt.s32.totalorder (!%p227_p3), %s840_s18, 1  ;;  %v850_v0 = vmov (!%p227_p3), 0   ;;  %v824_v25 = vld [vmem:[%s1004_s3] sm:$0xff] (!%p227_p3)   ;;  %v825_v29 = vld [vmem:[%s1004_s3 + $0x8] sm:$0xff] (!%p227_p3)   ;;  %vm419_vm0 = vcmask (!%p227_p3), 261120   ;;  %vm529_vm1 = vcmask (!%p227_p3), 257024  }
   0x7   : > { %230 = sbr.rel (%p227_p3) target bundleno = 684 (0x2ac), region = 40  ;;  %823 = vset.pattern.permute.xlu1 (!%p227_p3), %v850_v0  ;;  %822 = vset.pattern.permute.xlu0 (!%p227_p3), %v850_v0  ;;  %v727_v43 = vld [vmem:[%s1005_s4] ss:$0 sm:$0xff] (!%p227_p3)  ;;  %s851_s17 = smov (!%p227_p3), 96  }
   0x8   : > { %777 = vmatprep.subr.bf16.mxu0 (!%p227_p3), %v824_v25  ;;  %789 = vmatprep.subr.bf16.mxu1 (!%p227_p3), %v824_v25 }
   0x9   : > { %778 = vmatpush3.bf16.msra.mxu0 (!%p227_p3), %v824_v25  ;;  %791 = vmatpush3.bf16.msra.mxu1 (!%p227_p3), %v824_v25 }
   0xa   : > { %779 = vmatprep.subr.bf16.mxu0 (!%p227_p3), %v825_v29  ;;  %790 = vmatprep.subr.bf16.mxu1 (!%p227_p3), %v825_v29 }
   0xd   : > { %780 = vmatpush3.bf16.msra.mxu0 (!%p227_p3), %v825_v29  ;;  %792 = vmatpush3.bf16.msra.mxu1 (!%p227_p3), %v825_v29 }
   0xe   : > { %s1012_s18 = smov (!%p271_p4, %s840_s18), 1 }
   0xf   : > { %s760_s22 = sshll.u32 %s1012_s18, 5  ;;  %s793_s11 = smul.u32 96, %s1012_s18 }
  0x10   : > { %s288_s25 = scalar_lea.vmem %s1003_s2, %s760_s22  ;;  %s283_s28 = scalar_lea.vmem %s1002_s1, %s760_s22 }
  0x11   : > { %v332_v1 = vld [vmem:[%s288_s25] sm:$0xff]  ;;  %v306_v3 = vld [vmem:[%s283_s28 + $0x10] sm:$0xff]  ;;  %v305_v4 = vld [vmem:[%s283_s28 + $0x8] sm:$0xff]  ;;  %s278_s6 = scalar_lea.vmem %s1001_s0, %s760_s22  ;;  %s926_s16 = scalar_lea.vmem %s1006_s5, %s793_s11 }
  0x12   : > { %v304_v2 = vld [vmem:[%s283_s28] sm:$0xff]  ;;  %338 = vperm.xlu1 %823, %v332_v1   ;;  %v307_v5 = vld [vmem:[%s283_s28 + $0x18] sm:$0xff]  ;;  %v333_v6 = vld [vmem:[%s288_s25 + $0x8] sm:$0xff]  ;;  %s852_s18 = smov 64  }
  0x13   : > { %310 = vperm.xlu0 %822, %v304_v2   ;;  %v335_v7 = vld [vmem:[%s288_s25 + $0x18] sm:$0xff]  ;;  %v334_v8 = vld [vmem:[%s288_s25 + $0x10] sm:$0xff]  ;;  %v300_v9 = vld [vmem:[%s278_s6] sm:$0xff] }
  0x14   : > { %v301_v16 = vld [vmem:[%s278_s6 + $0x8] sm:$0xff]  ;;  %v302_v18 = vld [vmem:[%s278_s6 + $0x10] sm:$0xff]  ;;  %v303_v23 = vld [vmem:[%s278_s6 + $0x18] sm:$0xff] }
  0x16   : > { %320 = vperm.xlu1 %823, %v306_v3  }
  0x17   : > { %315 = vperm.xlu0 %822, %v305_v4  }
  0x1a   : > { %325 = vperm.xlu1 %823, %v307_v5  }
  0x1b   : > { %343 = vperm.xlu0 %822, %v333_v6  }
  0x1e   : > { %353 = vperm.xlu1 %823, %v335_v7  }
  0x1f   : > { %348 = vperm.xlu0 %822, %v334_v8  }
  0x91   : > { %v339_v10 = vpop.permute.xlu1 %338 }
  0x92   : > { %v311_v11 = vpop.permute.xlu0 %310 }
  0x93   : > { %v328_v12 = vmul.f32 %v311_v11, %v300_v9 }
  0x95   : > { %v356_v13 = vadd.f32 %v339_v10, %v328_v12  ;;  %v321_v14 = vpop.permute.xlu1 %320 }
  0x96   : > { %v316_v15 = vpop.permute.xlu0 %315  ;;  %v330_v22 = vmul.f32 %v321_v14, %v302_v18 }
  0x97   : > { %360 = vxpose.xlu0.b32.start [1/4] (short) (narrow) %v356_v13, 64  ;;  %v329_v17 = vmul.f32 %v316_v15, %v301_v16 }
  0x99   : > { %v326_v19 = vpop.permute.xlu1 %325 }
  0x9a   : > { %v344_v20 = vpop.permute.xlu0 %343  ;;  %v331_v28 = vmul.f32 %v326_v19, %v303_v23 }
  0x9b   : > { %v357_v21 = vadd.f32 %v344_v20, %v329_v17 }
  0x9d   : > { %361 = vxpose.xlu0.b32.cont [2/4] (short) (narrow) %v357_v21, 64  ;;  %v354_v27 = vpop.permute.xlu1 %353 }
  0x9e   : > { %v349_v24 = vpop.permute.xlu0 %348  ;;  %v359_v30 = vadd.f32 %v354_v27, %v331_v28 }
  0x9f   : > { %v358_v26 = vadd.f32 %v349_v24, %v330_v22 }
  0xa1   : > { %362 = vxpose.xlu0.b32.cont [3/4] (short) (narrow) %v358_v26, 64 }
  0xa5   : > { %363 = vxpose.xlu0.b32.end [4/4] (short) (narrow) %v359_v30, 64 }
 0x119   : > { %v376_v31 = vpop.trf.xlu0 }
 0x11d   : > { %v377_v32 = vpop.trf.xlu0 }
 0x11e   : > { %v392_v33 = vpack.c.bf16 %v377_v32, %v376_v31 }
 0x120   : > { %781 = vmatprep.mubr.msk.bf16.mxu0 %vm419_vm0, %v392_v33 }
 0x121   : > { %v378_v34 = vpop.trf.xlu0 }
 0x125   : > { %v379_v35 = vpop.trf.xlu0 }
 0x126   : > { %v393_v36 = vpack.c.bf16 %v379_v35, %v378_v34 }
 0x128   : > { %782 = vmatmul.mubr.msk.bf16.vlgmr.msra.gmra.mrb[0].mxu0 %vm419_vm0, %v393_v36 }
 0x129   : > { %v380_v37 = vpop.trf.xlu0 }
 0x12d   : > { %v381_v38 = vpop.trf.xlu0 }
 0x12e   : > { %v394_v39 = vpack.c.bf16 %v381_v38, %v380_v37 }
 0x130   : > { %785 = vmatprep.mubr.msk.bf16.mxu1 %vm419_vm0, %v394_v39 }
 0x131   : > { %v382_v40 = vpop.trf.xlu0 }
 0x135   : > { %v383_v41 = vpop.trf.xlu0 }
 0x136   : > { %v395_v42 = vpack.c.bf16 %v383_v41, %v382_v40 }
 0x138   : > { %786 = vmatmul.mubr.msk.bf16.vlgmr.msra.gmra.mrb[0].mxu1 %vm419_vm0, %v395_v42 }
 0x1fb   : > { %v783_v44 = vpop.f32.mrb[0].mxu0 }
 0x1fc   : > { %v475_v45 = vadd.f32 %v783_v44, %v727_v43  ;;  %v466_v46 = vpop.f32.mrb[1].mxu0 }
 0x1fd   : > { %v467_v47 = vadd.f32 %v727_v43, %v466_v46  ;;  %v784_v48 = vpop.f32.mrb[2].mxu0 }
 0x1fe   : > { %v765_v49 = vpack.c.bf16 %v475_v45, %v475_v45  ;;  %v478_v50 = vadd.f32 %v784_v48, %v727_v43  ;;  %v469_v51 = vpop.f32.mrb[3].mxu0 }
 0x1ff   : > { %v763_v52 = vpack.c.bf16 %v467_v47, %v467_v47  ;;  %v470_v53 = vadd.f32 %v727_v43, %v469_v51 }
 0x200   : > { %532 = vst.msk [vmem:[%s926_s16 + $0x8] sm:$0xf] %vm529_vm1, %v765_v49  ;;  %v766_v54 = vpack.c.bf16 %v478_v50, %v478_v50  ;;  %542 = vrot.lane.b32.xlu1 %v765_v49, %s851_s17 }
 0x201   : > { %530 = vst.msk [vmem:[%s926_s16] sm:$0xf] %vm529_vm1, %v763_v52  ;;  %v764_v55 = vpack.c.bf16 %v470_v53, %v470_v53 }
 0x202   : > { %533 = vst.msk [vmem:[%s926_s16 + $0xc] sm:$0xf] %vm529_vm1, %v766_v54  ;;  %577 = vrot.lane.b32.xlu0 %v766_v54, %s852_s18 }
 0x203   : > { %531 = vst.msk [vmem:[%s926_s16 + $0x4] sm:$0xf] %vm529_vm1, %v764_v55 }
 0x204   : > { %575 = vrot.lane.b32.xlu1 %v765_v49, %s852_s18 }
 0x208   : > { %538 = vrot.lane.b32.xlu1 %v763_v52, %s851_s17 }
 0x20b   : > { %v787_v56 = vpop.f32.mrb[0].mxu1 }
 0x20c   : > { %571 = vrot.lane.b32.xlu1 %v763_v52, %s852_s18  ;;  %v491_v57 = vadd.f32 %v787_v56, %v727_v43  ;;  %v482_v58 = vpop.f32.mrb[1].mxu1 }
 0x20d   : > { %v483_v59 = vadd.f32 %v727_v43, %v482_v58  ;;  %v788_v60 = vpop.f32.mrb[2].mxu1 }
 0x20e   : > { %v769_v61 = vpack.c.bf16 %v491_v57, %v491_v57  ;;  %v494_v62 = vadd.f32 %v788_v60, %v727_v43  ;;  %v485_v63 = vpop.f32.mrb[3].mxu1 }
 0x20f   : > { %v767_v0 = vpack.c.bf16 %v483_v59, %v483_v59  ;;  %v486_v1 = vadd.f32 %v727_v43, %v485_v63 }
 0x210   : > { %544 = vrot.lane.b32.xlu1 %v766_v54, %s851_s17  ;;  %536 = vst.msk [vmem:[%s926_s16 + $0x18] sm:$0xf] %vm529_vm1, %v769_v61  ;;  %v770_v2 = vpack.c.bf16 %v494_v62, %v494_v62 }
 0x211   : > { %534 = vst.msk [vmem:[%s926_s16 + $0x10] sm:$0xf] %vm529_vm1, %v767_v0  ;;  %v768_v3 = vpack.c.bf16 %v486_v1, %v486_v1 }
 0x212   : > { %537 = vst.msk [vmem:[%s926_s16 + $0x1c] sm:$0xf] %vm529_vm1, %v770_v2 }
 0x213   : > { %535 = vst.msk [vmem:[%s926_s16 + $0x14] sm:$0xf] %vm529_vm1, %v768_v3 }
 0x214   : > { %540 = vrot.lane.b32.xlu1 %v764_v55, %s851_s17 }
 0x218   : > { %573 = vrot.lane.b32.xlu1 %v764_v55, %s852_s18 }
 0x21c   : > { %550 = vrot.lane.b32.xlu1 %v769_v61, %s851_s17 }
 0x220   : > { %583 = vrot.lane.b32.xlu1 %v769_v61, %s852_s18 }
 0x224   : > { %546 = vrot.lane.b32.xlu1 %v767_v0, %s851_s17 }
 0x228   : > { %579 = vrot.lane.b32.xlu1 %v767_v0, %s852_s18 }
 0x22c   : > { %552 = vrot.lane.b32.xlu1 %v770_v2, %s851_s17 }
 0x230   : > { %548 = vrot.lane.b32.xlu1 %v768_v3, %s851_s17 }
 0x234   : > { %581 = vrot.lane.b32.xlu1 %v768_v3, %s852_s18 }
 0x238   : > { %585 = vrot.lane.b32.xlu1 %v770_v2, %s852_s18 }
 0x272   : > { %v543_v4 = vpop.permute.xlu1 %542 }
 0x273   : > { %744 = vst.msk [vmem:[%s926_s16 + $0x28] sm:$0xf] %vm529_vm1, %v543_v4 }
 0x274   : > { %v578_v5 = vpop.permute.xlu0 %577 }
 0x275   : > { %753 = vst.msk [vmem:[%s926_s16 + $0x4c] sm:$0xf] %vm529_vm1, %v578_v5 }
 0x276   : > { %v576_v6 = vpop.permute.xlu1 %575 }
 0x277   : > { %752 = vst.msk [vmem:[%s926_s16 + $0x48] sm:$0xf] %vm529_vm1, %v576_v6 }
 0x27a   : > { %v539_v7 = vpop.permute.xlu1 %538 }
 0x27b   : > { %742 = vst.msk [vmem:[%s926_s16 + $0x20] sm:$0xf] %vm529_vm1, %v539_v7 }
 0x27e   : > { %v572_v8 = vpop.permute.xlu1 %571 }
 0x27f   : > { %750 = vst.msk [vmem:[%s926_s16 + $0x40] sm:$0xf] %vm529_vm1, %v572_v8 }
 0x282   : > { %v545_v9 = vpop.permute.xlu1 %544 }
 0x283   : > { %745 = vst.msk [vmem:[%s926_s16 + $0x2c] sm:$0xf] %vm529_vm1, %v545_v9 }
 0x286   : > { %v541_v10 = vpop.permute.xlu1 %540 }
 0x287   : > { %743 = vst.msk [vmem:[%s926_s16 + $0x24] sm:$0xf] %vm529_vm1, %v541_v10 }
 0x28a   : > { %v574_v11 = vpop.permute.xlu1 %573 }
 0x28b   : > { %751 = vst.msk [vmem:[%s926_s16 + $0x44] sm:$0xf] %vm529_vm1, %v574_v11 }
 0x28e   : > { %v551_v12 = vpop.permute.xlu1 %550 }
 0x28f   : > { %748 = vst.msk [vmem:[%s926_s16 + $0x38] sm:$0xf] %vm529_vm1, %v551_v12 }
 0x292   : > { %v584_v13 = vpop.permute.xlu1 %583 }
 0x293   : > { %756 = vst.msk [vmem:[%s926_s16 + $0x58] sm:$0xf] %vm529_vm1, %v584_v13 }
 0x296   : > { %v547_v14 = vpop.permute.xlu1 %546 }
 0x297   : > { %746 = vst.msk [vmem:[%s926_s16 + $0x30] sm:$0xf] %vm529_vm1, %v547_v14 }
 0x29a   : > { %v580_v15 = vpop.permute.xlu1 %579 }
 0x29b   : > { %754 = vst.msk [vmem:[%s926_s16 + $0x50] sm:$0xf] %vm529_vm1, %v580_v15 }
 0x29e   : > { %v553_v16 = vpop.permute.xlu1 %552 }
 0x29f   : > { %749 = vst.msk [vmem:[%s926_s16 + $0x3c] sm:$0xf] %vm529_vm1, %v553_v16 }
 0x2a2   : > { %v549_v17 = vpop.permute.xlu1 %548 }
 0x2a3   : > { %747 = vst.msk [vmem:[%s926_s16 + $0x34] sm:$0xf] %vm529_vm1, %v549_v17 }
 0x2a6   : > { %v582_v18 = vpop.permute.xlu1 %581 }
 0x2a7   : > { %755 = vst.msk [vmem:[%s926_s16 + $0x54] sm:$0xf] %vm529_vm1, %v582_v18 }
 0x2aa   : > { %v586_v19 = vpop.permute.xlu1 %585 }
 0x2ab   : > { %757 = vst.msk [vmem:[%s926_s16 + $0x5c] sm:$0xf] %vm529_vm1, %v586_v19 }
 0x2ac PF: > { %s15_s20 = sadd.s32 1, %s848_s20   ;;  %s1007_s18 = smov %s844_s19 }
 0x2ad   : > { %p12_p5 = scmp.ge.s32.totalorder %s15_s20, 4   ;;  %s1008_s19 = smov %s1010_s21 }
 0x2af   :  { %14 = sbr.rel (!%p12_p5) target bundleno = 2 (0x2), region = 78 }

</bundles_post_ra>
